<compile_context>
chip_gen: v7x
topology: tpu7x:2x2x1
jax: 0.10.0
libtpu: 0.0.40
codegen_flags: <defaults>
</compile_context>

<pallas_src>
import functools
import math

import jax
import jax.numpy as jnp
from jax.experimental import pallas as pl
from jax.experimental.pallas import tpu as pltpu

# ---------------- model hyper-parameters (match the containing module's usage) -------------
IN_DIM = 32          # query_dim
RANK_DIM = 8         # LoRA rank
OUT_DIM = 16         # inner_dim (heads * dim_head)
LN_EPS = 1e-5

# ---------------- lane-dense token packing ---------------------------------------------------
TOK_PER_ROW = 8                       # tokens per packed row
PACK_IN = TOK_PER_ROW * IN_DIM        # 256 lanes: contiguous reshape of (T, 32)
PACK_RANK = TOK_PER_ROW * RANK_DIM    # 64 lanes
PACK_OUT = TOK_PER_ROW * OUT_DIM      # 128 lanes: contiguous reshape of (T, 16)
MAX_ROW_TILE = 2048                   # 16384 tokens / step (~3 MiB HBM traffic per step)
TARGET_STEPS = 8                      # aim for >= 8 grid steps (v7x megacore sharding)


def _round_up(v, m):
    return (v + m - 1) // m * m


def _cdiv(a, b):
    return (a + b - 1) // b


# ---------------- kernel ---------------------------------------------------------------------
def lora_mlp_kernel(x_ref, w1b_ref, w2b_ref, m1_ref, m2_ref, bv_ref, ov_ref, o_ref):
    # x_ref: (row_tile, 256) -- 8 tokens per row, 32 features each (token-major, lane-dense).
    x = x_ref[...].astype(jnp.float32)

    w1b = w1b_ref[...]          # (256, 64)   blockdiag(8 x W1)
    w2b = w2b_ref[...]          # (64, 128)   blockdiag(8 x diag(gamma1) @ W2)
    m1 = m1_ref[...]            # (64, 64)    per-token group-mean matrix (rank groups of 8)
    m2 = m2_ref[...]            # (128, 128)  per-token group-mean matrix (out groups of 16)
    lb1 = bv_ref[...]           # (1, 64)     linear-1 bias, tiled over token groups
    lb2 = ov_ref[0:1, :]        # (1, 128)    beta1 @ W2 + linear-2 bias, tiled
    g2 = ov_ref[1:2, :]         # (1, 128)    LN2 gamma, tiled
    b2 = ov_ref[2:3, :]         # (1, 128)    LN2 beta, tiled

    # Linear(in_dim -> rank_dim) + bias: 8 tokens per row in one MXU matmul.
    y = jnp.dot(x, w1b, preferred_element_type=jnp.float32) + lb1            # (rt, 64)

    # LayerNorm(rank_dim): biased variance, eps inside rsqrt (torch semantics).
    mu1 = jnp.dot(y, m1, preferred_element_type=jnp.float32)
    c1 = y - mu1
    var1 = jnp.dot(c1 * c1, m1, preferred_element_type=jnp.float32)
    n1 = c1 * jax.lax.rsqrt(var1 + LN_EPS)

    # Linear(rank_dim -> out_dim); LN1's (gamma1, beta1) already folded into w2b / lb2.
    z = jnp.dot(n1, w2b, preferred_element_type=jnp.float32) + lb2           # (rt, 128)

    # LayerNorm(out_dim) + affine.
    mu2 = jnp.dot(z, m2, preferred_element_type=jnp.float32)
    c2 = z - mu2
    var2 = jnp.dot(c2 * c2, m2, preferred_element_type=jnp.float32)
    n2 = c2 * jax.lax.rsqrt(var2 + LN_EPS)

    o_ref[...] = (n2 * g2 + b2).astype(o_ref.dtype)


# ---------------- parameter packing ----------------------------------------------------------
def pack_params(params, bias):
    """Pre-fold + pack parameters for the token-packed kernel.

    * Block-diagonal (8 tokens / row) copies of the weight matrices.
    * LN1 affine folded into the second linear: W2' = diag(g1) @ W2, lb2' = b1 @ W2 + lb2.
    * Block-diagonal group-averaging matrices implement per-token LN mean/variance as matmuls.
    * Bias/gamma/beta vectors tiled across the 8 token groups (full-lane rows).
    """
    eye = jnp.eye(TOK_PER_ROW, dtype=jnp.float32)
    w1 = params["w1"].astype(jnp.float32)                 # (IN, RANK)
    w2 = params["w2"].astype(jnp.float32)                 # (RANK, OUT)
    g1, b1 = params["g1"], params["b1"]
    g2, b2 = params["g2"], params["b2"]
    lb1 = params["lb1"] if bias else jnp.zeros((RANK_DIM,), jnp.float32)
    lb2 = params["lb2"] if bias else jnp.zeros((OUT_DIM,), jnp.float32)

    w2_fold = g1[:, None] * w2                             # diag(gamma1) @ W2
    lb2_fold = b1 @ w2 + lb2                               # beta1 @ W2 + lb2

    w1_blk = jnp.kron(eye, w1)                             # (256, 64)
    w2_blk = jnp.kron(eye, w2_fold)                        # (64, 128)
    m1 = jnp.kron(eye, jnp.full((RANK_DIM, RANK_DIM), 1.0 / RANK_DIM, jnp.float32))
    m2 = jnp.kron(eye, jnp.full((OUT_DIM, OUT_DIM), 1.0 / OUT_DIM, jnp.float32))
    bvec = jnp.tile(lb1, TOK_PER_ROW)[None, :]             # (1, 64)
    ovec = jnp.stack([jnp.tile(lb2_fold, TOK_PER_ROW),
                      jnp.tile(g2, TOK_PER_ROW),
                      jnp.tile(b2, TOK_PER_ROW)])          # (3, 128)
    return w1_blk, w2_blk, m1, m2, bvec, ovec


# ---------------- wrapper ---------------------------------------------------------------------
@functools.partial(jax.jit, static_argnames=("bias",))
def lora_mlp(x, params, bias=True):
    """LoRAMLP forward: x (..., IN_DIM) -> (..., OUT_DIM)."""
    *lead, in_dim = x.shape
    assert in_dim == IN_DIM
    tokens = math.prod(lead) if lead else 1

    # ---- token tiling (all static) ----
    rows = _cdiv(tokens, TOK_PER_ROW)
    # Adaptive tile: target ~TARGET_STEPS grid steps, cap at 16K tokens/step, minimize padding.
    row_tile = min(MAX_ROW_TILE, max(8, _round_up(_cdiv(rows, TARGET_STEPS), 8)))
    rows_pad = _round_up(rows, row_tile)
    n_steps = rows_pad // row_tile
    pad_tokens = rows_pad * TOK_PER_ROW - tokens

    # ---- free contiguous relayout (no HBM transpose); pad only when needed ----
    x2 = x.reshape(tokens, IN_DIM)
    if pad_tokens:
        # Zero-padded tokens: LN sees var=0, stays finite (eps inside rsqrt), sliced off below.
        x2 = jnp.pad(x2, ((0, pad_tokens), (0, 0)))
    x_packed = x2.reshape(rows_pad, PACK_IN)

    w1_blk, w2_blk, m1, m2, bvec, ovec = pack_params(params, bias)

    const = lambda i: (0, 0)
    out_packed = pl.pallas_call(
        lora_mlp_kernel,
        out_shape=jax.ShapeDtypeStruct((rows_pad, PACK_OUT), x.dtype),
        grid=(n_steps,),
        in_specs=[
            pl.BlockSpec((row_tile, PACK_IN), lambda i: (i, 0)),
            pl.BlockSpec((PACK_IN, PACK_RANK), const),
            pl.BlockSpec((PACK_RANK, PACK_OUT), const),
            pl.BlockSpec((PACK_RANK, PACK_RANK), const),
            pl.BlockSpec((PACK_OUT, PACK_OUT), const),
            pl.BlockSpec((1, PACK_RANK), const),
            pl.BlockSpec((3, PACK_OUT), const),
        ],
        out_specs=pl.BlockSpec((row_tile, PACK_OUT), lambda i: (i, 0)),
        compiler_params=pltpu.CompilerParams(
            dimension_semantics=("parallel",),
            vmem_limit_bytes=32 * 1024 * 1024,
        ),
    )(x_packed, w1_blk, w2_blk, m1, m2, bvec, ovec)

    out_flat = out_packed.reshape(rows_pad * TOK_PER_ROW, OUT_DIM)
    if pad_tokens:
        out_flat = out_flat[:tokens]
    return out_flat.reshape(*lead, OUT_DIM)


# ---------------- deterministic parameter init + pure-JAX reference ---------------------------
def init_params(key):
    ks = jax.random.split(key, 8)
    p = {}
    p["w1"] = 0.1 * jax.random.normal(ks[0], (IN_DIM, RANK_DIM), jnp.float32)
    p["lb1"] = 0.1 * jax.random.normal(ks[1], (RANK_DIM,), jnp.float32)
    p["g1"] = 1.0 + 0.1 * jax.random.normal(ks[2], (RANK_DIM,), jnp.float32)
    p["b1"] = 0.1 * jax.random.normal(ks[3], (RANK_DIM,), jnp.float32)
    p["w2"] = 0.1 * jax.random.normal(ks[4], (RANK_DIM, OUT_DIM), jnp.float32)
    p["lb2"] = 0.1 * jax.random.normal(ks[5], (OUT_DIM,), jnp.float32)
    p["g2"] = 1.0 + 0.1 * jax.random.normal(ks[6], (OUT_DIM,), jnp.float32)
    p["b2"] = 0.1 * jax.random.normal(ks[7], (OUT_DIM,), jnp.float32)
    return p


def reference(x, p, bias=True):
    def ln(y, g, b):
        mu = jnp.mean(y, axis=-1, keepdims=True)
        var = jnp.mean((y - mu) ** 2, axis=-1, keepdims=True)
        return (y - mu) / jnp.sqrt(var + LN_EPS) * g + b

    y = x @ p["w1"]
    if bias:
        y = y + p["lb1"]
    y = ln(y, p["g1"], p["b1"])
    z = y @ p["w2"]
    if bias:
        z = z + p["lb2"]
    return ln(z, p["g2"], p["b2"])


if __name__ == "__main__":
    key = jax.random.PRNGKey(0)
    kx, kx2, kp = jax.random.split(key, 3)

    params = init_params(kp)

    # Small shape consistent with the module's usage (batch=2, seq=8, query_dim=32).
    B, N = 2, 8
    x = jax.random.normal(kx, (B, N, IN_DIM), jnp.float32)
    out = jax.block_until_ready(lora_mlp(x, params, bias=True))
    ref = reference(x, params, bias=True)
    assert out.shape == (B, N, OUT_DIM)
    assert jnp.allclose(out, ref, atol=1e-4, rtol=1e-4), (
        f"max abs err = {jnp.max(jnp.abs(out - ref))}")

    # Ragged token count (exercises the pad/slice path).
    x_odd = jax.random.normal(kx2, (3, 5, IN_DIM), jnp.float32)
    out_odd = jax.block_until_ready(lora_mlp(x_odd, params, bias=True))
    ref_odd = reference(x_odd, params, bias=True)
    assert out_odd.shape == (3, 5, OUT_DIM)
    assert jnp.allclose(out_odd, ref_odd, atol=1e-4, rtol=1e-4), (
        f"max abs err = {jnp.max(jnp.abs(out_odd - ref_odd))}")

    print("KERNEL_OK")
</pallas_src>

<mosaic_0001>
module attributes {stable_mosaic.version = 11 : i64} {
  func.func @lora_mlp_kernel(%arg0: i32, %arg1: memref<8x256xf32, #tpu.memory_space<vmem>>, %arg2: memref<256x64xf32, #tpu.memory_space<vmem>>, %arg3: memref<64x128xf32, #tpu.memory_space<vmem>>, %arg4: memref<64x64xf32, #tpu.memory_space<vmem>>, %arg5: memref<128x128xf32, #tpu.memory_space<vmem>>, %arg6: memref<1x64xf32, #tpu.memory_space<vmem>>, %arg7: memref<3x128xf32, #tpu.memory_space<vmem>>, %arg8: memref<8x128xf32, #tpu.memory_space<vmem>>) attributes {dimension_semantics = [#tpu.dimension_semantics<parallel>], iteration_bounds = array<i64: 1>, scalar_prefetch = 0 : i64, scratch_operands = 0 : i64, tpu.core_type = #tpu.core_type<tc>, window_params = [{transform_indices = @transform_0, window_bounds = array<i64: 8, 256>}, {pipeline_mode = #tpu.pipeline_mode<synchronous>, transform_indices = @transform_1, window_bounds = array<i64: 256, 64>}, {pipeline_mode = #tpu.pipeline_mode<synchronous>, transform_indices = @transform_2, window_bounds = array<i64: 64, 128>}, {pipeline_mode = #tpu.pipeline_mode<synchronous>, transform_indices = @transform_3, window_bounds = array<i64: 64, 64>}, {pipeline_mode = #tpu.pipeline_mode<synchronous>, transform_indices = @transform_4, window_bounds = array<i64: 128, 128>}, {pipeline_mode = #tpu.pipeline_mode<synchronous>, transform_indices = @transform_5, window_bounds = array<i64: 1, 64>}, {pipeline_mode = #tpu.pipeline_mode<synchronous>, transform_indices = @transform_6, window_bounds = array<i64: 3, 128>}, {transform_indices = @transform_7, window_bounds = array<i64: 8, 128>}]} {
    %c0 = arith.constant 0 : index
    %c0_0 = arith.constant 0 : index
    %0 = vector.load %arg1[%c0, %c0_0] : memref<8x256xf32, #tpu.memory_space<vmem>>, vector<8x256xf32>
    %c0_1 = arith.constant 0 : index
    %c0_2 = arith.constant 0 : index
    %1 = vector.load %arg2[%c0_1, %c0_2] : memref<256x64xf32, #tpu.memory_space<vmem>>, vector<256x64xf32>
    %c0_3 = arith.constant 0 : index
    %c0_4 = arith.constant 0 : index
    %2 = vector.load %arg3[%c0_3, %c0_4] : memref<64x128xf32, #tpu.memory_space<vmem>>, vector<64x128xf32>
    %c0_5 = arith.constant 0 : index
    %c0_6 = arith.constant 0 : index
    %3 = vector.load %arg4[%c0_5, %c0_6] : memref<64x64xf32, #tpu.memory_space<vmem>>, vector<64x64xf32>
    %c0_7 = arith.constant 0 : index
    %c0_8 = arith.constant 0 : index
    %4 = vector.load %arg5[%c0_7, %c0_8] : memref<128x128xf32, #tpu.memory_space<vmem>>, vector<128x128xf32>
    %c0_9 = arith.constant 0 : index
    %c0_10 = arith.constant 0 : index
    %5 = vector.load %arg6[%c0_9, %c0_10] : memref<1x64xf32, #tpu.memory_space<vmem>>, vector<1x64xf32>
    %c0_11 = arith.constant 0 : index
    %c0_12 = arith.constant 0 : index
    %6 = vector.load %arg7[%c0_11, %c0_12] : memref<3x128xf32, #tpu.memory_space<vmem>>, vector<1x128xf32>
    %c1 = arith.constant 1 : index
    %c0_13 = arith.constant 0 : index
    %7 = vector.load %arg7[%c1, %c0_13] : memref<3x128xf32, #tpu.memory_space<vmem>>, vector<1x128xf32>
    %c2 = arith.constant 2 : index
    %c0_14 = arith.constant 0 : index
    %8 = vector.load %arg7[%c2, %c0_14] : memref<3x128xf32, #tpu.memory_space<vmem>>, vector<1x128xf32>
    %cst = arith.constant dense<0.000000e+00> : vector<8x64xf32>
    %9 = tpu.matmul %0, %1, %cst {dimension_numbers = #tpu.dot_dimension_numbers<[1], [0], [0], [1], [0, 0, 1, 1], [], []>} : vector<8x256xf32>, vector<256x64xf32>, vector<8x64xf32> -> vector<8x64xf32>
    %10 = vector.broadcast %5 : vector<1x64xf32> to vector<8x64xf32>
    %11 = arith.addf %9, %10 : vector<8x64xf32>
    %cst_15 = arith.constant dense<0.000000e+00> : vector<8x64xf32>
    %12 = tpu.matmul %11, %3, %cst_15 {dimension_numbers = #tpu.dot_dimension_numbers<[1], [0], [0], [1], [0, 0, 1, 1], [], []>} : vector<8x64xf32>, vector<64x64xf32>, vector<8x64xf32> -> vector<8x64xf32>
    %13 = arith.subf %11, %12 : vector<8x64xf32>
    %14 = arith.mulf %13, %13 : vector<8x64xf32>
    %cst_16 = arith.constant dense<0.000000e+00> : vector<8x64xf32>
    %15 = tpu.matmul %14, %3, %cst_16 {dimension_numbers = #tpu.dot_dimension_numbers<[1], [0], [0], [1], [0, 0, 1, 1], [], []>} : vector<8x64xf32>, vector<64x64xf32>, vector<8x64xf32> -> vector<8x64xf32>
    %cst_17 = arith.constant 9.99999974E-6 : f32
    %16 = vector.broadcast %cst_17 : f32 to vector<8x64xf32>
    %17 = arith.addf %15, %16 : vector<8x64xf32>
    %18 = math.rsqrt %17 : vector<8x64xf32>
    %19 = arith.mulf %13, %18 : vector<8x64xf32>
    %cst_18 = arith.constant dense<0.000000e+00> : vector<8x128xf32>
    %20 = tpu.matmul %19, %2, %cst_18 {dimension_numbers = #tpu.dot_dimension_numbers<[1], [0], [0], [1], [0, 0, 1, 1], [], []>} : vector<8x64xf32>, vector<64x128xf32>, vector<8x128xf32> -> vector<8x128xf32>
    %21 = vector.broadcast %6 : vector<1x128xf32> to vector<8x128xf32>
    %22 = arith.addf %20, %21 : vector<8x128xf32>
    %cst_19 = arith.constant dense<0.000000e+00> : vector<8x128xf32>
    %23 = tpu.matmul %22, %4, %cst_19 {dimension_numbers = #tpu.dot_dimension_numbers<[1], [0], [0], [1], [0, 0, 1, 1], [], []>} : vector<8x128xf32>, vector<128x128xf32>, vector<8x128xf32> -> vector<8x128xf32>
    %24 = arith.subf %22, %23 : vector<8x128xf32>
    %25 = arith.mulf %24, %24 : vector<8x128xf32>
    %cst_20 = arith.constant dense<0.000000e+00> : vector<8x128xf32>
    %26 = tpu.matmul %25, %4, %cst_20 {dimension_numbers = #tpu.dot_dimension_numbers<[1], [0], [0], [1], [0, 0, 1, 1], [], []>} : vector<8x128xf32>, vector<128x128xf32>, vector<8x128xf32> -> vector<8x128xf32>
    %cst_21 = arith.constant 9.99999974E-6 : f32
    %27 = vector.broadcast %cst_21 : f32 to vector<8x128xf32>
    %28 = arith.addf %26, %27 : vector<8x128xf32>
    %29 = math.rsqrt %28 : vector<8x128xf32>
    %30 = arith.mulf %24, %29 : vector<8x128xf32>
    %31 = vector.broadcast %7 : vector<1x128xf32> to vector<8x128xf32>
    %32 = arith.mulf %30, %31 : vector<8x128xf32>
    %33 = vector.broadcast %8 : vector<1x128xf32> to vector<8x128xf32>
    %34 = arith.addf %32, %33 : vector<8x128xf32>
    %c0_22 = arith.constant 0 : index
    %c0_23 = arith.constant 0 : index
    %35 = vector.load %arg8[%c0_22, %c0_23] : memref<8x128xf32, #tpu.memory_space<vmem>>, vector<8x128xf32>
    tpu.vector_store %arg8[%c0_22, %c0_23], %34 {strides = array<i32>} : memref<8x128xf32, #tpu.memory_space<vmem>>, vector<8x128xf32>,
    return
  }
  func.func @transform_0(%arg0: i32) -> (i32, i32) {
    %c0_i32 = arith.constant 0 : i32
    %c0_i32_0 = arith.constant 0 : i32
    return %arg0, %c0_i32 : i32, i32
  }
  func.func @transform_1(%arg0: i32) -> (i32, i32) {
    %c0_i32 = arith.constant 0 : i32
    %c0_i32_0 = arith.constant 0 : i32
    %c0_i32_1 = arith.constant 0 : i32
    return %c0_i32, %c0_i32_0 : i32, i32
  }
  func.func @transform_2(%arg0: i32) -> (i32, i32) {
    %c0_i32 = arith.constant 0 : i32
    %c0_i32_0 = arith.constant 0 : i32
    %c0_i32_1 = arith.constant 0 : i32
    return %c0_i32, %c0_i32_0 : i32, i32
  }
  func.func @transform_3(%arg0: i32) -> (i32, i32) {
    %c0_i32 = arith.constant 0 : i32
    %c0_i32_0 = arith.constant 0 : i32
    %c0_i32_1 = arith.constant 0 : i32
    return %c0_i32, %c0_i32_0 : i32, i32
  }
  func.func @transform_4(%arg0: i32) -> (i32, i32) {
    %c0_i32 = arith.constant 0 : i32
    %c0_i32_0 = arith.constant 0 : i32
    %c0_i32_1 = arith.constant 0 : i32
    return %c0_i32, %c0_i32_0 : i32, i32
  }
  func.func @transform_5(%arg0: i32) -> (i32, i32) {
    %c0_i32 = arith.constant 0 : i32
    %c0_i32_0 = arith.constant 0 : i32
    %c0_i32_1 = arith.constant 0 : i32
    return %c0_i32, %c0_i32_0 : i32, i32
  }
  func.func @transform_6(%arg0: i32) -> (i32, i32) {
    %c0_i32 = arith.constant 0 : i32
    %c0_i32_0 = arith.constant 0 : i32
    %c0_i32_1 = arith.constant 0 : i32
    return %c0_i32, %c0_i32_0 : i32, i32
  }
  func.func @transform_7(%arg0: i32) -> (i32, i32) {
    %c0_i32 = arith.constant 0 : i32
    %c0_i32_0 = arith.constant 0 : i32
    return %arg0, %c0_i32 : i32, i32
  }
}

</mosaic_0001>

<bundles_post_ra>
// kernel: tile.28
= control target key start
LH: loop header
LB: loop body
LE: loop exit
PB: predicated region body
PF: predicated region fallthrough
CT: control target
= control target key end

     0   :  { %s22_s0 = inlined_call_operand.vmem [shape: f32[16], index: 0, kind: input, shape index: {}]   ;;  %s23_s1 = inlined_call_operand.vmem [shape: f32[8,16], index: 1, kind: output, shape index: {}]  }
   0x1   :  { %v4_v0 = vld [vmem:[%s22_s0] ss:$0 sm:$0xff] }
   0x2   :  { %5 = vst [vmem:[%s23_s1] sm:$0xff] %v4_v0 }

// kernel: tile.37
= control target key start
LH: loop header
LB: loop body
LE: loop exit
PB: predicated region body
PF: predicated region fallthrough
CT: control target
= control target key end

     0   :  { %s67_s10 = smov 112   ;;  %s68_s11 = smov 80   ;;  %vm3_vm0 = vcmask 130048   ;;  %vm9_vm1 = vcmask 1048448   ;;  %vm15_vm2 = vcmask 917248   ;;  %vm21_vm3 = vcmask 786048   ;;  %s111_s0 = inlined_call_operand.vmem [shape: f32[8,16], index: 0, kind: input, shape index: {}]   ;;  %s112_s1 = inlined_call_operand.vmem [shape: f32[1,128], index: 1, kind: output, shape index: {}]  }
   0x1   :  { %v53_v0 = vld [vmem:[%s111_s0 + $0x7] sm:$0x1]   ;;  %v55_v1 = vld [vmem:[%s111_s0 + $0x5] sm:$0x1]   ;;  %v54_v2 = vld [vmem:[%s111_s0 + $0x6] sm:$0x1]  }
   0x2   :  { %7 = vrot.lane.b32.xlu0 %v53_v0, %s67_s10  ;;  %19 = vrot.lane.b32.xlu1 %v55_v1, %s68_s11  ;;  %v56_v3 = vld [vmem:[%s111_s0 + $0x4] sm:$0x1]   ;;  %v2_v4 = vld [vmem:[%s111_s0] sm:$0x1]   ;;  %s69_s18 = smov 96   ;;  %s70_s19 = smov 64  }
   0x3   :  { %4 = vst.msk [vmem:[#allocation0] sm:$0x1] %vm3_vm0, %v2_v4   ;;  %v57_v5 = vld [vmem:[%s111_s0 + $0x3] sm:$0x1]   ;;  %v58_v6 = vld [vmem:[%s111_s0 + $0x2] sm:$0x1]  }
   0x4   :  { %s71_s24 = smov 48   ;;  %s72_s25 = smov 32   ;;  %v59_v7 = vld [vmem:[%s111_s0 + $0x1] sm:$0x1]   ;;  %vm27_vm4 = vcmask 654848   ;;  %vm33_vm5 = vcmask 523648  }
   0x5   :  { %s73_s0 = smov 16   ;;  %vm39_vm6 = vcmask 392448   ;;  %vm45_vm7 = vcmask 261248  }
   0x6   :  { %13 = vrot.lane.b32.xlu0 %v54_v2, %s69_s18  ;;  %25 = vrot.lane.b32.xlu1 %v56_v3, %s70_s19 }
   0xa   :  { %31 = vrot.lane.b32.xlu0 %v57_v5, %s71_s24  ;;  %37 = vrot.lane.b32.xlu1 %v58_v6, %s72_s25 }
   0xe   :  { %43 = vrot.lane.b32.xlu0 %v59_v7, %s73_s0 }
  0x74   :  { %v8_v8 = vpop.permute.xlu0 %7   ;;  %v20_v9 = vpop.permute.xlu1 %19  }
  0x75   :  { %10 = vst.msk [vmem:[#allocation0] sm:$0x1] %vm9_vm1, %v8_v8  }
  0x78   :  { %v14_v10 = vpop.permute.xlu0 %13   ;;  %v26_v11 = vpop.permute.xlu1 %25  }
  0x79   :  { %16 = vst.msk [vmem:[#allocation0] sm:$0x1] %vm15_vm2, %v14_v10  }
  0x7a   :  { %22 = vst.msk [vmem:[#allocation0] sm:$0x1] %vm21_vm3, %v20_v9  }
  0x7b   :  { %28 = vst.msk [vmem:[#allocation0] sm:$0x1] %vm27_vm4, %v26_v11  }
  0x7c   :  { %v32_v12 = vpop.permute.xlu0 %31   ;;  %v38_v13 = vpop.permute.xlu1 %37  }
  0x7d   :  { %34 = vst.msk [vmem:[#allocation0] sm:$0x1] %vm33_vm5, %v32_v12  }
  0x7e   :  { %40 = vst.msk [vmem:[#allocation0] sm:$0x1] %vm39_vm6, %v38_v13  }
  0x80   :  { %v44_v14 = vpop.permute.xlu0 %43  }
  0x81   :  { %46 = vst.msk [vmem:[#allocation0] sm:$0x1] %vm45_vm7, %v44_v14  }
  0x88   :  { %v50_v15 = vld [vmem:[#allocation0] sm:$0x1] }
  0x89   :  { %52 = vst [vmem:[%s112_s1] sm:$0x1] %v50_v15 }

// kernel: tile.23
= control target key start
LH: loop header
LB: loop body
LE: loop exit
PB: predicated region body
PF: predicated region fallthrough
CT: control target
= control target key end

     0   :  { %s22_s0 = inlined_call_operand.vmem [shape: f32[8], index: 0, kind: input, shape index: {}]   ;;  %s23_s1 = inlined_call_operand.vmem [shape: f32[8,8], index: 1, kind: output, shape index: {}]  }
   0x1   :  { %v4_v0 = vld [vmem:[%s22_s0] ss:$0 sm:$0xff] }
   0x2   :  { %5 = vst [vmem:[%s23_s1] sm:$0xff] %v4_v0 }

// kernel: tile.24
= control target key start
LH: loop header
LB: loop body
LE: loop exit
PB: predicated region body
PF: predicated region fallthrough
CT: control target
= control target key end

     0   :  { %s67_s10 = smov 56   ;;  %s68_s11 = smov 40   ;;  %vm3_vm0 = vcmask 64512   ;;  %vm9_vm1 = vcmask 523712   ;;  %vm15_vm2 = vcmask 458112   ;;  %vm21_vm3 = vcmask 392512   ;;  %s111_s0 = inlined_call_operand.vmem [shape: f32[8,8], index: 0, kind: input, shape index: {}]   ;;  %s112_s1 = inlined_call_operand.vmem [shape: f32[1,64], index: 1, kind: output, shape index: {}]  }
   0x1   :  { %v53_v0 = vld [vmem:[%s111_s0 + $0x7] sm:$0x1]   ;;  %v55_v1 = vld [vmem:[%s111_s0 + $0x5] sm:$0x1]   ;;  %v54_v2 = vld [vmem:[%s111_s0 + $0x6] sm:$0x1]  }
   0x2   :  { %7 = vrot.lane.b32.xlu0 %v53_v0, %s67_s10  ;;  %19 = vrot.lane.b32.xlu1 %v55_v1, %s68_s11  ;;  %v56_v3 = vld [vmem:[%s111_s0 + $0x4] sm:$0x1]   ;;  %v2_v4 = vld [vmem:[%s111_s0] sm:$0x1]   ;;  %s69_s18 = smov 48   ;;  %s70_s19 = smov 32  }
   0x3   :  { %4 = vst.msk [vmem:[#allocation0] sm:$0x1] %vm3_vm0, %v2_v4   ;;  %v57_v5 = vld [vmem:[%s111_s0 + $0x3] sm:$0x1]   ;;  %v58_v6 = vld [vmem:[%s111_s0 + $0x2] sm:$0x1]  }
   0x4   :  { %s71_s24 = smov 24   ;;  %s72_s25 = smov 16   ;;  %v59_v7 = vld [vmem:[%s111_s0 + $0x1] sm:$0x1]   ;;  %vm27_vm4 = vcmask 326912   ;;  %vm33_vm5 = vcmask 261312  }
   0x5   :  { %s73_s0 = smov 8   ;;  %vm39_vm6 = vcmask 195712   ;;  %vm45_vm7 = vcmask 130112  }
   0x6   :  { %13 = vrot.lane.b32.xlu0 %v54_v2, %s69_s18  ;;  %25 = vrot.lane.b32.xlu1 %v56_v3, %s70_s19 }
   0xa   :  { %31 = vrot.lane.b32.xlu0 %v57_v5, %s71_s24  ;;  %37 = vrot.lane.b32.xlu1 %v58_v6, %s72_s25 }
   0xe   :  { %43 = vrot.lane.b32.xlu0 %v59_v7, %s73_s0 }
  0x74   :  { %v8_v8 = vpop.permute.xlu0 %7   ;;  %v20_v9 = vpop.permute.xlu1 %19  }
  0x75   :  { %10 = vst.msk [vmem:[#allocation0] sm:$0x1] %vm9_vm1, %v8_v8  }
  0x78   :  { %v14_v10 = vpop.permute.xlu0 %13   ;;  %v26_v11 = vpop.permute.xlu1 %25  }
  0x79   :  { %16 = vst.msk [vmem:[#allocation0] sm:$0x1] %vm15_vm2, %v14_v10  }
  0x7a   :  { %22 = vst.msk [vmem:[#allocation0] sm:$0x1] %vm21_vm3, %v20_v9  }
  0x7b   :  { %28 = vst.msk [vmem:[#allocation0] sm:$0x1] %vm27_vm4, %v26_v11  }
  0x7c   :  { %v32_v12 = vpop.permute.xlu0 %31   ;;  %v38_v13 = vpop.permute.xlu1 %37  }
  0x7d   :  { %34 = vst.msk [vmem:[#allocation0] sm:$0x1] %vm33_vm5, %v32_v12  }
  0x7e   :  { %40 = vst.msk [vmem:[#allocation0] sm:$0x1] %vm39_vm6, %v38_v13  }
  0x80   :  { %v44_v14 = vpop.permute.xlu0 %43  }
  0x81   :  { %46 = vst.msk [vmem:[#allocation0] sm:$0x1] %vm45_vm7, %v44_v14  }
  0x88   :  { %v50_v15 = vld [vmem:[#allocation0] sm:$0x1] }
  0x89   :  { %52 = vst [vmem:[%s112_s1] sm:$0x1] %v50_v15 }

// kernel: lora_mlp.1
= control target key start
LH: loop header
LB: loop body
LE: loop exit
PB: predicated region body
PF: predicated region fallthrough
CT: control target
= control target key end

     0   :  { %v912_v3 = vmov 0.0|0.0   ;;  %vm913_vm0 = vmmov 0   ;;  %v914_v63 = vmov 0.0   ;;  %vm172_vm1 = vcmask 523264   ;;  %s1218_s1 = inlined_call_operand.vmem [shape: f32[256,64], index: 1, kind: input, shape index: {}]   ;;  %s1219_s0 = inlined_call_operand.vmem [shape: f32[8,256], index: 0, kind: input, shape index: {}]   ;;  %s1220_s3 = inlined_call_operand.vmem [shape: f32[64,64], index: 3, kind: input, shape index: {}]   ;;  %s1221_s5 = inlined_call_operand.vmem [shape: f32[1,64], index: 5, kind: input, shape index: {}]   ;;  %s1222_s2 = inlined_call_operand.vmem [shape: f32[64,128], index: 2, kind: input, shape index: {}]   ;;  %s1223_s4 = inlined_call_operand.vmem [shape: f32[128,128], index: 4, kind: input, shape index: {}]   ;;  %s1224_s6 = inlined_call_operand.vmem [shape: f32[3,128], index: 6, kind: input, shape index: {}]   ;;  %s1225_s7 = inlined_call_operand.vmem [shape: f32[8,128], index: 7, kind: output, shape index: {}]  }
   0x1   :  { %v44_v0 = vld [vmem:[%s1218_s1 + $0x80] sm:$0xff]  ;;  %v45_v1 = vld [vmem:[%s1218_s1 + $0x88] sm:$0xff]  ;;  %821 = vmatprep.subr.bf16.mxu1 %v912_v3  ;;  %v46_v6 = vld [vmem:[%s1218_s1 + $0x90] sm:$0xff]  ;;  %678 = vmatprep.mubr.msk.f32.mxu1 %vm913_vm0, %v914_v63 }
   0x2   :  { %v28_v2 = vld [vmem:[%s1218_s1] sm:$0xff]  ;;  %v789_v4 = vpack.c.bf16 %v45_v1, %v44_v0  ;;  %v29_v5 = vld [vmem:[%s1218_s1 + $0x8] sm:$0xff]  ;;  %v47_v7 = vld [vmem:[%s1218_s1 + $0x98] sm:$0xff] }
   0x3   :  { %v791_v8 = vpack.c.bf16 %v29_v5, %v28_v2  ;;  %v793_v9 = vpack.c.bf16 %v47_v7, %v46_v6  ;;  %v30_v10 = vld [vmem:[%s1218_s1 + $0x10] sm:$0xff]  ;;  %v31_v11 = vld [vmem:[%s1218_s1 + $0x18] sm:$0xff]  ;;  %v48_v12 = vld [vmem:[%s1218_s1 + $0xa0] sm:$0xff] }
   0x4   :  { %790 = vmatprep.subr.bf16.mxu0 %v789_v4  ;;  %v49_v13 = vld [vmem:[%s1218_s1 + $0xa8] sm:$0xff]  ;;  %v795_v14 = vpack.c.bf16 %v31_v11, %v30_v10  ;;  %v32_v16 = vld [vmem:[%s1218_s1 + $0x20] sm:$0xff]  ;;  %v50_v18 = vld [vmem:[%s1218_s1 + $0xb0] sm:$0xff] }
   0x5   :  { %792 = vmatpush3.bf16.msra.mxu0 %v791_v8  ;;  %v797_v15 = vpack.c.bf16 %v49_v13, %v48_v12  ;;  %v33_v17 = vld [vmem:[%s1218_s1 + $0x28] sm:$0xff]  ;;  %v51_v19 = vld [vmem:[%s1218_s1 + $0xb8] sm:$0xff]  ;;  %v34_v22 = vld [vmem:[%s1218_s1 + $0x30] sm:$0xff] }
   0x6   :  { %794 = vmatprep.subr.bf16.mxu0 %v793_v9  ;;  %v799_v20 = vpack.c.bf16 %v33_v17, %v32_v16  ;;  %v801_v21 = vpack.c.bf16 %v51_v19, %v50_v18  ;;  %v35_v23 = vld [vmem:[%s1218_s1 + $0x38] sm:$0xff]  ;;  %v52_v24 = vld [vmem:[%s1218_s1 + $0xc0] sm:$0xff]  ;;  %v53_v25 = vld [vmem:[%s1218_s1 + $0xc8] sm:$0xff] }
   0x7   :  { %v27_v26 = vld [vmem:[%s1219_s0 + $0x8] sm:$0xff]  ;;  %v68_v27 = vld [vmem:[%s1220_s3] sm:$0xff]  ;;  %v803_v29 = vpack.c.bf16 %v35_v23, %v34_v22  ;;  %v70_v31 = vld [vmem:[%s1220_s3 + $0x10] sm:$0xff]  ;;  %v805_v33 = vpack.c.bf16 %v53_v25, %v52_v24 }
   0x8   :  { %166 = vmatprep.mubr.f32.mxu0 %v27_v26  ;;  %v69_v28 = vld [vmem:[%s1220_s3 + $0x8] sm:$0xff]  ;;  %v71_v32 = vld [vmem:[%s1220_s3 + $0x18] sm:$0xff]  ;;  %v36_v34 = vld [vmem:[%s1218_s1 + $0x40] sm:$0xff] }
   0x9   :  { %796 = vmatpush3.bf16.msra.mxu0 %v795_v14  ;;  %v1019_v30 = vpack.c.bf16 %v69_v28, %v68_v27  ;;  %v37_v35 = vld [vmem:[%s1218_s1 + $0x48] sm:$0xff]  ;;  %v54_v36 = vld [vmem:[%s1218_s1 + $0xd0] sm:$0xff]  ;;  %v55_v37 = vld [vmem:[%s1218_s1 + $0xd8] sm:$0xff]  ;;  %v825_v38 = vpack.c.bf16 %v71_v32, %v70_v31 }
   0xa   :  { %798 = vmatprep.subr.bf16.mxu0 %v797_v15  ;;  %v72_v39 = vld [vmem:[%s1220_s3 + $0x20] sm:$0xff]  ;;  %v73_v40 = vld [vmem:[%s1220_s3 + $0x28] sm:$0xff]  ;;  %v807_v41 = vpack.c.bf16 %v37_v35, %v36_v34  ;;  %v809_v42 = vpack.c.bf16 %v55_v37, %v54_v36  ;;  %v38_v43 = vld [vmem:[%s1218_s1 + $0x50] sm:$0xff] }
   0xb   :  { %823 = vmatpush3.bf16.msra.mxu1 %v1019_v30  ;;  %v39_v44 = vld [vmem:[%s1218_s1 + $0x58] sm:$0xff]  ;;  %v56_v45 = vld [vmem:[%s1218_s1 + $0xe0] sm:$0xff]  ;;  %v57_v46 = vld [vmem:[%s1218_s1 + $0xe8] sm:$0xff]  ;;  %v828_v47 = vpack.c.bf16 %v73_v40, %v72_v39 }
   0xc   :  { %824 = vmatprep.subr.bf16.mxu1 %v912_v3  ;;  %v811_v48 = vpack.c.bf16 %v39_v44, %v38_v43  ;;  %v813_v49 = vpack.c.bf16 %v57_v46, %v56_v45  ;;  %v40_v50 = vld [vmem:[%s1218_s1 + $0x60] sm:$0xff]  ;;  %v41_v51 = vld [vmem:[%s1218_s1 + $0x68] sm:$0xff]  ;;  %v58_v52 = vld [vmem:[%s1218_s1 + $0xf0] sm:$0xff] }
   0xd   :  { %800 = vmatpush3.bf16.msra.mxu0 %v799_v20  ;;  %v59_v53 = vld [vmem:[%s1218_s1 + $0xf8] sm:$0xff]  ;;  %v815_v54 = vpack.c.bf16 %v41_v51, %v40_v50  ;;  %v42_v56 = vld [vmem:[%s1218_s1 + $0x70] sm:$0xff]  ;;  %v26_v59 = vld [vmem:[%s1219_s0] sm:$0xff] }
   0xe   :  { %802 = vmatprep.subr.bf16.mxu0 %v801_v21  ;;  %v817_v55 = vpack.c.bf16 %v59_v53, %v58_v52  ;;  %v43_v57 = vld [vmem:[%s1218_s1 + $0x78] sm:$0xff]  ;;  %v74_v60 = vld [vmem:[%s1220_s3 + $0x30] sm:$0xff]  ;;  %v559_v1 = vld [vmem:[%s1221_s5] ss:$0 sm:$0xff] }
   0xf   :  { %826 = vmatpush3.bf16.msra.mxu1 %v825_v38  ;;  %v819_v58 = vpack.c.bf16 %v43_v57, %v42_v56  ;;  %v75_v61 = vld [vmem:[%s1220_s3 + $0x38] sm:$0xff]  ;;  %v60_v10 = vld [vmem:[%s1222_s2] sm:$0xff]  ;;  %v61_v11 = vld [vmem:[%s1222_s2 + $0x8] sm:$0xff] }
  0x10   :  { %827 = vmatprep.subr.bf16.mxu1 %v912_v3  ;;  %v831_v62 = vpack.c.bf16 %v75_v61, %v74_v60  ;;  %v846_v12 = vpack.c.bf16 %v61_v11, %v60_v10  ;;  %v62_v13 = vld [vmem:[%s1222_s2 + $0x10] sm:$0xff]  ;;  %v63_v14 = vld [vmem:[%s1222_s2 + $0x18] sm:$0xff]  ;;  %v64_v16 = vld [vmem:[%s1222_s2 + $0x20] sm:$0xff] }
  0x11   :  { %804 = vmatpush3.bf16.msra.mxu0 %v803_v29  ;;  %v849_v15 = vpack.c.bf16 %v63_v14, %v62_v13  ;;  %v65_v17 = vld [vmem:[%s1222_s2 + $0x28] sm:$0xff]  ;;  %v66_v19 = vld [vmem:[%s1222_s2 + $0x30] sm:$0xff]  ;;  %v67_v20 = vld [vmem:[%s1222_s2 + $0x38] sm:$0xff] }
  0x12   :  { %806 = vmatprep.subr.bf16.mxu0 %v805_v33  ;;  %v852_v18 = vpack.c.bf16 %v65_v17, %v64_v16  ;;  %v855_v21 = vpack.c.bf16 %v67_v20, %v66_v19  ;;  %v76_v22 = vld [vmem:[%s1223_s4] sm:$0xff]  ;;  %v77_v23 = vld [vmem:[%s1223_s4 + $0x8] sm:$0xff]  ;;  %v78_v24 = vld [vmem:[%s1223_s4 + $0x10] sm:$0xff] }
  0x13   :  { %829 = vmatpush3.bf16.msra.mxu1 %v828_v47  ;;  %v858_v25 = vpack.c.bf16 %v77_v23, %v76_v22  ;;  %v79_v26 = vld [vmem:[%s1223_s4 + $0x18] sm:$0xff]  ;;  %v80_v28 = vld [vmem:[%s1223_s4 + $0x20] sm:$0xff]  ;;  %v81_v29 = vld [vmem:[%s1223_s4 + $0x28] sm:$0xff] }
  0x14   :  { %830 = vmatprep.subr.bf16.mxu1 %v912_v3  ;;  %v861_v27 = vpack.c.bf16 %v79_v26, %v78_v24  ;;  %v82_v31 = vld [vmem:[%s1223_s4 + $0x30] sm:$0xff]  ;;  %v83_v32 = vld [vmem:[%s1223_s4 + $0x38] sm:$0xff]  ;;  %v84_v34 = vld [vmem:[%s1223_s4 + $0x40] sm:$0xff] }
  0x15   :  { %808 = vmatpush3.bf16.msra.mxu0 %v807_v41  ;;  %v867_v33 = vpack.c.bf16 %v83_v32, %v82_v31  ;;  %v85_v35 = vld [vmem:[%s1223_s4 + $0x48] sm:$0xff]  ;;  %v86_v37 = vld [vmem:[%s1223_s4 + $0x50] sm:$0xff]  ;;  %v88_v40 = vld [vmem:[%s1223_s4 + $0x60] sm:$0xff] }
  0x16   :  { %810 = vmatprep.subr.bf16.mxu0 %v809_v42  ;;  %v870_v36 = vpack.c.bf16 %v85_v35, %v84_v34  ;;  %v89_v41 = vld [vmem:[%s1223_s4 + $0x68] sm:$0xff]  ;;  %v562_v51 = vld [vmem:[%s1224_s6] ss:$0 sm:$0xff] }
  0x17   :  { %832 = vmatpush3.bf16.msra.mxu1 %v831_v62  ;;  %v876_v42 = vpack.c.bf16 %v89_v41, %v88_v40 }
  0x18   :  { %833 = vmatprep.subr.bf16.mxu1 %v912_v3 }
  0x19   :  { %812 = vmatpush3.bf16.msra.mxu0 %v811_v48  ;;  %v90_v48 = vld [vmem:[%s1223_s4 + $0x70] sm:$0xff] }
  0x1a   :  { %814 = vmatprep.subr.bf16.mxu0 %v813_v49  ;;  %v91_v49 = vld [vmem:[%s1223_s4 + $0x78] sm:$0xff] }
  0x1b   :  { %v879_v50 = vpack.c.bf16 %v91_v49, %v90_v48 }
  0x1d   :  { %816 = vmatpush3.bf16.msra.mxu0 %v815_v54 }
  0x1e   :  { %818 = vmatprep.subr.bf16.mxu0 %v817_v55 }
  0x21   :  { %820 = vmatpush3.bf16.msra.mxu0 %v819_v58 }
  0x22   :  { %845 = vmatprep.subr.bf16.mxu0 %v912_v3 }
  0x24   :  { %167 = vmatmul.mubr.f32.vlgmr.msra.gmra.mrb[0].mxu0 %v26_v59 }
  0x25   :  { %716 = vmatprep.mubr.msk.f32.mxu0 %vm913_vm0, %v914_v63  ;;  %847 = vmatpush3.bf16.msra.mxu0 %v846_v12 }
  0x26   :  { %848 = vmatprep.subr.bf16.mxu0 %v912_v3 }
  0x29   :  { %850 = vmatpush3.bf16.msra.mxu0 %v849_v15 }
  0x2a   :  { %851 = vmatprep.subr.bf16.mxu0 %v912_v3 }
  0x2d   :  { %853 = vmatpush3.bf16.msra.mxu0 %v852_v18 }
  0x2e   :  { %854 = vmatprep.subr.bf16.mxu0 %v912_v3 }
  0x31   :  { %856 = vmatpush3.bf16.msra.mxu0 %v855_v21 }
  0x32   :  { %881 = vmatprep.subr.bf16.mxu0 %v912_v3 }
  0xf7   :  { %v598_v0 = vpop.f32.mrb[0].mxu0 }
  0xf8   :  { %v599_v2 = vpop.f32.mrb[1].mxu0 }
  0xf9   :  { %v600_v4 = vadd.f32 %v599_v2, %v598_v0  ;;  %v565_v0 = vld [vmem:[%s1224_s6 + $0x2] ss:$0 sm:$0xff] }
  0xfb   :  { %v169_v5 = vadd.f32 %v600_v4, %v559_v1 }
  0xfd   :  { %679 = vmatmul.mubr.msk.f32.vlgmr.msra.gmra.mrb[0].mxu1 %vm172_vm1, %v169_v5 }
  0xfe   :  { %835 = vmatpush3.bf16.msra.mxu1 %v1019_v30  ;;  %697 = vmatprep.mubr.msk.f32.mxu1 %vm913_vm0, %v914_v63  ;;  %v864_v30 = vpack.c.bf16 %v81_v29, %v80_v28 }
  0xff   :  { %836 = vmatprep.subr.bf16.mxu1 %v912_v3 }
 0x102   :  { %838 = vmatpush3.bf16.msra.mxu1 %v825_v38  ;;  %v87_v38 = vld [vmem:[%s1223_s4 + $0x58] sm:$0xff] }
 0x103   :  { %839 = vmatprep.subr.bf16.mxu1 %v912_v3  ;;  %v873_v39 = vpack.c.bf16 %v87_v38, %v86_v37 }
 0x106   :  { %841 = vmatpush3.bf16.msra.mxu1 %v828_v47 }
 0x107   :  { %842 = vmatprep.subr.bf16.mxu1 %v912_v3 }
 0x10a   :  { %844 = vmatpush3.bf16.msra.mxu1 %v831_v62  ;;  %v564_v62 = vld [vmem:[%s1224_s6 + $0x1] ss:$0 sm:$0xff] }
 0x10b   :  { %857 = vmatprep.subr.bf16.mxu1 %v912_v3 }
 0x1d0   :  { %v242_v6 = vpop.f32.mrb[0].mxu1 }
 0x1d1   :  { %v1105_v7 = vsub.f32 %v169_v5, %v242_v6  ;;  %v680_v8 = vpop.f32.mrb[1].mxu1 }
 0x1d3   :  { %v247_v9 = vmul.f32 %v1105_v7, %v1105_v7 }
 0x1d5   :  { %698 = vmatmul.mubr.msk.f32.vlgmr.msra.gmra.mrb[2].mxu1 %vm172_vm1, %v247_v9 }
 0x1d6   :  { %751 = vmatprep.mubr.msk.f32.mxu1 %vm913_vm0, %v914_v63  ;;  %859 = vmatpush3.bf16.msra.mxu1 %v858_v25 }
 0x1d7   :  { %860 = vmatprep.subr.bf16.mxu1 %v912_v3 }
 0x1da   :  { %862 = vmatpush3.bf16.msra.mxu1 %v861_v27 }
 0x1db   :  { %863 = vmatprep.subr.bf16.mxu1 %v912_v3 }
 0x1de   :  { %865 = vmatpush3.bf16.msra.mxu1 %v864_v30 }
 0x1df   :  { %866 = vmatprep.subr.bf16.mxu1 %v912_v3 }
 0x1e2   :  { %868 = vmatpush3.bf16.msra.mxu1 %v867_v33 }
 0x1e3   :  { %869 = vmatprep.subr.bf16.mxu1 %v912_v3 }
 0x1e6   :  { %871 = vmatpush3.bf16.msra.mxu1 %v870_v36 }
 0x1e7   :  { %872 = vmatprep.subr.bf16.mxu1 %v912_v3 }
 0x1ea   :  { %874 = vmatpush3.bf16.msra.mxu1 %v873_v39 }
 0x1eb   :  { %875 = vmatprep.subr.bf16.mxu1 %v912_v3 }
 0x1ee   :  { %877 = vmatpush3.bf16.msra.mxu1 %v876_v42 }
 0x1ef   :  { %878 = vmatprep.subr.bf16.mxu1 %v912_v3 }
 0x1f2   :  { %880 = vmatpush3.bf16.msra.mxu1 %v879_v50 }
 0x2a8   :  { %v317_v43 = vpop.f32.mrb[2].mxu1 }
 0x2a9   :  { %v318_v44 = vadd.f32 1e-05, %v317_v43  ;;  %v699_v45 = vpop.f32.mrb[3].mxu1 }
 0x2ab   :  { %908 = vrsqrt.f32 %v318_v44 }
 0x2b5   :  { %v909_v46 = vpop.eup %908 }
 0x2b6   :  { %v322_v47 = vmul.f32 %v909_v46, %v1105_v7 }
 0x2b8   :  { %717 = vmatmul.mubr.msk.f32.vlgmr.msra.gmra.mrb[2].mxu0 %vm172_vm1, %v322_v47 }
 0x2b9   :  { %883 = vmatpush3.bf16.msra.mxu0 %v858_v25  ;;  %786 = vmatprep.mubr.msk.f32.mxu0 %vm913_vm0, %v914_v63 }
 0x2ba   :  { %884 = vmatprep.subr.bf16.mxu0 %v912_v3 }
 0x2bd   :  { %886 = vmatpush3.bf16.msra.mxu0 %v861_v27 }
 0x2be   :  { %887 = vmatprep.subr.bf16.mxu0 %v912_v3 }
 0x2c1   :  { %889 = vmatpush3.bf16.msra.mxu0 %v864_v30 }
 0x2c2   :  { %890 = vmatprep.subr.bf16.mxu0 %v912_v3 }
 0x2c5   :  { %892 = vmatpush3.bf16.msra.mxu0 %v867_v33 }
 0x2c6   :  { %893 = vmatprep.subr.bf16.mxu0 %v912_v3 }
 0x2c9   :  { %895 = vmatpush3.bf16.msra.mxu0 %v870_v36 }
 0x2ca   :  { %896 = vmatprep.subr.bf16.mxu0 %v912_v3 }
 0x2cd   :  { %898 = vmatpush3.bf16.msra.mxu0 %v873_v39 }
 0x2ce   :  { %899 = vmatprep.subr.bf16.mxu0 %v912_v3 }
 0x2d1   :  { %901 = vmatpush3.bf16.msra.mxu0 %v876_v42 }
 0x2d2   :  { %902 = vmatprep.subr.bf16.mxu0 %v912_v3 }
 0x2d5   :  { %904 = vmatpush3.bf16.msra.mxu0 %v879_v50 }
 0x38b   :  { %v396_v52 = vpop.f32.mrb[2].mxu0 }
 0x38c   :  { %v397_v53 = vadd.f32 %v562_v51, %v396_v52  ;;  %v718_v54 = vpop.f32.mrb[3].mxu0 }
 0x38e   :  { %752 = vmatmul.mubr.f32.vlgmr.msra.gmra.mrb[4].mxu1 %v397_v53 }
 0x461   :  { %v466_v3 = vpop.f32.mrb[4].mxu1 }
 0x462   :  { %v470_v55 = vsub.f32 %v397_v53, %v466_v3  ;;  %v753_v56 = vpop.f32.mrb[5].mxu1 }
 0x464   :  { %v471_v57 = vmul.f32 %v470_v55, %v470_v55 }
 0x466   :  { %787 = vmatmul.mubr.f32.vlgmr.msra.gmra.mrb[4].mxu0 %v471_v57 }
 0x539   :  { %v538_v58 = vpop.f32.mrb[4].mxu0 }
 0x53a   :  { %v539_v59 = vadd.f32 1e-05, %v538_v58  ;;  %v788_v60 = vpop.f32.mrb[5].mxu0 }
 0x53c   :  { %910 = vrsqrt.f32 %v539_v59 }
 0x546   :  { %v911_v61 = vpop.eup %910 }
 0x547   :  { %v543_v63 = vmul.f32 %v911_v61, %v470_v55 }
 0x549   :  { %v548_v1 = vmul.f32 %v564_v62, %v543_v63 }
 0x54b   :  { %v553_v2 = vadd.f32 %v565_v0, %v548_v1 }
 0x54d   :  { %554 = vst [vmem:[%s1225_s7] sm:$0xff] %v553_v2 }

</bundles_post_ra>
